<compile_context>
chip_gen: v6e
topology: v6e:2x2x1
jax: 0.10.0
libtpu: 0.0.40
codegen_flags: <defaults>
</compile_context>

<pallas_src>
import functools

import jax
import jax.numpy as jnp
import numpy as np
from jax.experimental import pallas as pl
from jax.experimental.pallas import tpu as pltpu

H1, H2 = 400, 300      # hidden widths fixed by the RegularActor architecture
LANE = 128


def _round_up(x, m):
    return ((x + m - 1) // m) * m


# ---------------------------------------------------------------- kernel ----
def actor_kernel(x_ref, n_ref, w1_ref, b1_ref, w2_ref, b2_ref, w3_ref, b3_ref,
                 o_ref, *, ap, max_action):
    cdt = w1_ref.dtype  # compute dtype of the MXU inputs (bf16 or f32)

    x = x_ref[...]
    h1 = jnp.dot(x, w1_ref[...], preferred_element_type=jnp.float32) + b1_ref[...]
    h1 = jnp.maximum(h1, 0.0).astype(cdt)                       # ReLU

    h2 = jnp.dot(h1, w2_ref[...], preferred_element_type=jnp.float32) + b2_ref[...]
    h2 = jnp.maximum(h2, 0.0).astype(cdt)                       # ReLU

    # fused [mean | log_std] matmul: N = 2*ap (lane-aligned split below)
    mz = jnp.dot(h2, w3_ref[...], preferred_element_type=jnp.float32) + b3_ref[...]
    mean_a = mz[:, :ap]
    log_std_a = mz[:, ap:]

    std_a = jnp.exp(log_std_a)                                  # EUP
    z = mean_a + std_a * n_ref[...]
    o_ref[...] = (max_action * jnp.tanh(z)).astype(o_ref.dtype)  # EUP + scale


# ------------------------------------------------------------- packing ------
def init_actor_params(key, state_dim, action_dim):
    """nn.Linear-style U(-1/sqrt(fan_in), 1/sqrt(fan_in)) init, f32 'master' copy."""
    ks = jax.random.split(key, 8)

    def lin(kw, kb, fan_in, fan_out):
        bound = 1.0 / np.sqrt(fan_in)
        w = jax.random.uniform(kw, (fan_in, fan_out), jnp.float32, -bound, bound)
        b = jax.random.uniform(kb, (fan_out,), jnp.float32, -bound, bound)
        return w, b

    w1, b1 = lin(ks[0], ks[1], state_dim, H1)
    w2, b2 = lin(ks[2], ks[3], H1, H2)
    wm, bm = lin(ks[4], ks[5], H2, action_dim)
    ws, bs = lin(ks[6], ks[7], H2, action_dim)
    return {"w1": w1, "b1": b1, "w2": w2, "b2": b2,
            "w_mean": wm, "b_mean": bm, "w_log_std": ws, "b_log_std": bs}


def pack_actor_params(params, *, weight_dtype=jnp.bfloat16):
    """One-time layout prep: pad all dims to 128-lane multiples, fuse mean/log_std,
    cast weights to the compute dtype (biases stay f32 for exact bias add)."""
    S = params["w1"].shape[0]
    A = params["w_mean"].shape[1]
    Sp, H1p, H2p, Ap = (_round_up(d, LANE) for d in (S, H1, H2, A))

    def pad_w(w, r, c):
        return jnp.pad(w, ((0, r - w.shape[0]), (0, c - w.shape[1]))).astype(weight_dtype)

    def pad_b(b, c):
        return jnp.pad(b.reshape(1, -1), ((0, 0), (0, c - b.shape[-1]))).astype(jnp.float32)

    w3 = jnp.concatenate(
        [pad_w(params["w_mean"], H2p, Ap), pad_w(params["w_log_std"], H2p, Ap)], axis=1)
    b3 = jnp.concatenate(
        [pad_b(params["b_mean"], Ap), pad_b(params["b_log_std"], Ap)], axis=1)

    return {
        "w1": pad_w(params["w1"], Sp, H1p), "b1": pad_b(params["b1"], H1p),
        "w2": pad_w(params["w2"], H1p, H2p), "b2": pad_b(params["b2"], H2p),
        "w3": w3, "b3": b3,
        "dims": (S, A, Sp, H1p, H2p, Ap),
    }


# ------------------------------------------------------------- wrapper ------
def regular_actor_forward(state, noise, packed, max_action, *, tb=256):
    """state: (B, state_dim) f32, noise: (B, action_dim) f32 standard normals."""
    S, A, Sp, H1p, H2p, Ap = packed["dims"]
    B = state.shape[0]
    cdt = packed["w1"].dtype

    # Batch tile: 256 (multiple of 256 fills the v6e/v7x MXU M-dim; >=2 grid
    # steps for B >= 512 engages both v7x TensorCores). Small batches shrink to
    # a single sublane-aligned tile.
    tb = min(tb, _round_up(B, 8))
    Bp = _round_up(B, tb)

    xs = jnp.pad(state, ((0, Bp - B), (0, Sp - S))).astype(cdt)   # lane-dense, cheap DMA
    nz = jnp.pad(noise, ((0, Bp - B), (0, Ap - A))).astype(jnp.float32)

    grid = (Bp // tb,)
    full = lambda i: (0, 0)   # weights/biases: same (whole) block every step -> resident

    nbytes = lambda a: a.size * a.dtype.itemsize
    bytes_accessed = (nbytes(xs) + nbytes(nz) + Bp * Ap * 4 +
                      sum(nbytes(packed[k]) for k in ("w1", "b1", "w2", "b2", "w3", "b3")))
    cost = pl.CostEstimate(
        flops=2 * Bp * (Sp * H1p + H1p * H2p + H2p * 2 * Ap),
        transcendentals=2 * Bp * Ap,           # exp + tanh
        bytes_accessed=bytes_accessed,
    )

    kernel = functools.partial(actor_kernel, ap=Ap, max_action=float(max_action))

    out = pl.pallas_call(
        kernel,
        out_shape=jax.ShapeDtypeStruct((Bp, Ap), jnp.float32),
        grid_spec=pltpu.PrefetchScalarGridSpec(
            num_scalar_prefetch=0,
            grid=grid,
            in_specs=[
                pl.BlockSpec((tb, Sp), lambda i: (i, 0)),   # state tile
                pl.BlockSpec((tb, Ap), lambda i: (i, 0)),   # noise tile
                pl.BlockSpec((Sp, H1p), full),              # w1
                pl.BlockSpec((1, H1p), full),               # b1
                pl.BlockSpec((H1p, H2p), full),             # w2
                pl.BlockSpec((1, H2p), full),               # b2
                pl.BlockSpec((H2p, 2 * Ap), full),          # [w_mean | w_log_std]
                pl.BlockSpec((1, 2 * Ap), full),            # [b_mean | b_log_std]
            ],
            out_specs=pl.BlockSpec((tb, Ap), lambda i: (i, 0)),
        ),
        compiler_params=pltpu.CompilerParams(
            dimension_semantics=("parallel",),
        ),
        cost_estimate=cost,
    )(xs, nz, packed["w1"], packed["b1"], packed["w2"], packed["b2"],
      packed["w3"], packed["b3"])

    return out[:B, :A]


# ---------------------------------------------------------- references ------
def regular_actor_ref(state, noise, params, max_action):
    a = jnp.maximum(state @ params["w1"] + params["b1"], 0.0)
    a = jnp.maximum(a @ params["w2"] + params["b2"], 0.0)
    mean_a = a @ params["w_mean"] + params["b_mean"]
    log_std_a = a @ params["w_log_std"] + params["b_log_std"]
    z = mean_a + jnp.exp(log_std_a) * noise
    return max_action * jnp.tanh(z)


def regular_actor_ref_quantized(state, noise, params, max_action, qdtype):
    """Same math, but with the kernel's weight/activation quantization replayed
    (f32 accumulation), so the bf16 fast path can be checked tightly."""
    q = lambda t: t.astype(qdtype).astype(jnp.float32)
    a = jnp.maximum(q(state) @ q(params["w1"]) + params["b1"], 0.0)
    a = jnp.maximum(q(a) @ q(params["w2"]) + params["b2"], 0.0)
    h = q(a)
    mean_a = h @ q(params["w_mean"]) + params["b_mean"]
    log_std_a = h @ q(params["w_log_std"]) + params["b_log_std"]
    z = mean_a + jnp.exp(log_std_a) * noise
    return max_action * jnp.tanh(z)


# ----------------------------------------------------------------- main -----
if __name__ == "__main__":
    key = jax.random.PRNGKey(0)
    kx, kn, kp = jax.random.split(key, 3)

    batch, state_dim, action_dim, max_action = 16, 11, 3, 1.0
    state = jax.random.normal(kx, (batch, state_dim), jnp.float32)
    noise = jax.random.normal(kn, (batch, action_dim), jnp.float32)
    params = init_actor_params(kp, state_dim, action_dim)

    # Fast path: bf16 weights/activations, f32 accumulation + f32 epilogue.
    packed_bf16 = pack_actor_params(params, weight_dtype=jnp.bfloat16)
    out_bf16 = jax.block_until_ready(
        regular_actor_forward(state, noise, packed_bf16, max_action))
    ref_q = jax.block_until_ready(
        regular_actor_ref_quantized(state, noise, params, max_action, jnp.bfloat16))
    np.testing.assert_allclose(np.asarray(out_bf16), np.asarray(ref_q),
                               rtol=5e-3, atol=5e-3)

    # Full f32 path, checked against the exact reference semantics.
    packed_f32 = pack_actor_params(params, weight_dtype=jnp.float32)
    out_f32 = jax.block_until_ready(
        regular_actor_forward(state, noise, packed_f32, max_action))
    ref = jax.block_until_ready(regular_actor_ref(state, noise, params, max_action))
    np.testing.assert_allclose(np.asarray(out_f32), np.asarray(ref),
                               rtol=1e-4, atol=1e-4)

    print("KERNEL_OK")
</pallas_src>

<mosaic_0001>
module attributes {stable_mosaic.version = 11 : i64} {
  func.func @actor_kernel(%arg0: i32, %arg1: memref<16x128xbf16, #tpu.memory_space<vmem>>, %arg2: memref<16x128xf32, #tpu.memory_space<vmem>>, %arg3: memref<128x512xbf16, #tpu.memory_space<vmem>>, %arg4: memref<1x512xf32, #tpu.memory_space<vmem>>, %arg5: memref<512x384xbf16, #tpu.memory_space<vmem>>, %arg6: memref<1x384xf32, #tpu.memory_space<vmem>>, %arg7: memref<384x256xbf16, #tpu.memory_space<vmem>>, %arg8: memref<1x256xf32, #tpu.memory_space<vmem>>, %arg9: memref<16x128xf32, #tpu.memory_space<vmem>>) attributes {dimension_semantics = [#tpu.dimension_semantics<parallel>], iteration_bounds = array<i64: 1>, scalar_prefetch = 0 : i64, scratch_operands = 0 : i64, tpu.core_type = #tpu.core_type<tc>, window_params = [{transform_indices = @transform_0, window_bounds = array<i64: 16, 128>}, {transform_indices = @transform_1, window_bounds = array<i64: 16, 128>}, {pipeline_mode = #tpu.pipeline_mode<synchronous>, transform_indices = @transform_2, window_bounds = array<i64: 128, 512>}, {pipeline_mode = #tpu.pipeline_mode<synchronous>, transform_indices = @transform_3, window_bounds = array<i64: 1, 512>}, {pipeline_mode = #tpu.pipeline_mode<synchronous>, transform_indices = @transform_4, window_bounds = array<i64: 512, 384>}, {pipeline_mode = #tpu.pipeline_mode<synchronous>, transform_indices = @transform_5, window_bounds = array<i64: 1, 384>}, {pipeline_mode = #tpu.pipeline_mode<synchronous>, transform_indices = @transform_6, window_bounds = array<i64: 384, 256>}, {pipeline_mode = #tpu.pipeline_mode<synchronous>, transform_indices = @transform_7, window_bounds = array<i64: 1, 256>}, {transform_indices = @transform_8, window_bounds = array<i64: 16, 128>}]} {
    %c0 = arith.constant 0 : index
    %c0_0 = arith.constant 0 : index
    %0 = vector.load %arg1[%c0, %c0_0] : memref<16x128xbf16, #tpu.memory_space<vmem>>, vector<16x128xbf16>
    %c0_1 = arith.constant 0 : index
    %c0_2 = arith.constant 0 : index
    %1 = vector.load %arg3[%c0_1, %c0_2] : memref<128x512xbf16, #tpu.memory_space<vmem>>, vector<128x512xbf16>
    %cst = arith.constant dense<0.000000e+00> : vector<16x512xf32>
    %2 = tpu.matmul %0, %1, %cst {dimension_numbers = #tpu.dot_dimension_numbers<[1], [0], [0], [1], [0, 0, 1, 1], [], []>} : vector<16x128xbf16>, vector<128x512xbf16>, vector<16x512xf32> -> vector<16x512xf32>
    %c0_3 = arith.constant 0 : index
    %c0_4 = arith.constant 0 : index
    %3 = vector.load %arg4[%c0_3, %c0_4] : memref<1x512xf32, #tpu.memory_space<vmem>>, vector<1x512xf32>
    %4 = vector.broadcast %3 : vector<1x512xf32> to vector<16x512xf32>
    %5 = arith.addf %2, %4 : vector<16x512xf32>
    %cst_5 = arith.constant 0.000000e+00 : f32
    %6 = vector.broadcast %cst_5 : f32 to vector<16x512xf32>
    %7 = arith.maximumf %5, %6 : vector<16x512xf32>
    %8 = arith.truncf %7 : vector<16x512xf32> to vector<16x512xbf16>
    %c0_6 = arith.constant 0 : index
    %c0_7 = arith.constant 0 : index
    %9 = vector.load %arg5[%c0_6, %c0_7] : memref<512x384xbf16, #tpu.memory_space<vmem>>, vector<512x384xbf16>
    %cst_8 = arith.constant dense<0.000000e+00> : vector<16x384xf32>
    %10 = tpu.matmul %8, %9, %cst_8 {dimension_numbers = #tpu.dot_dimension_numbers<[1], [0], [0], [1], [0, 0, 1, 1], [], []>} : vector<16x512xbf16>, vector<512x384xbf16>, vector<16x384xf32> -> vector<16x384xf32>
    %c0_9 = arith.constant 0 : index
    %c0_10 = arith.constant 0 : index
    %11 = vector.load %arg6[%c0_9, %c0_10] : memref<1x384xf32, #tpu.memory_space<vmem>>, vector<1x384xf32>
    %12 = vector.broadcast %11 : vector<1x384xf32> to vector<16x384xf32>
    %13 = arith.addf %10, %12 : vector<16x384xf32>
    %cst_11 = arith.constant 0.000000e+00 : f32
    %14 = vector.broadcast %cst_11 : f32 to vector<16x384xf32>
    %15 = arith.maximumf %13, %14 : vector<16x384xf32>
    %16 = arith.truncf %15 : vector<16x384xf32> to vector<16x384xbf16>
    %c0_12 = arith.constant 0 : index
    %c0_13 = arith.constant 0 : index
    %17 = vector.load %arg7[%c0_12, %c0_13] : memref<384x256xbf16, #tpu.memory_space<vmem>>, vector<384x256xbf16>
    %cst_14 = arith.constant dense<0.000000e+00> : vector<16x256xf32>
    %18 = tpu.matmul %16, %17, %cst_14 {dimension_numbers = #tpu.dot_dimension_numbers<[1], [0], [0], [1], [0, 0, 1, 1], [], []>} : vector<16x384xbf16>, vector<384x256xbf16>, vector<16x256xf32> -> vector<16x256xf32>
    %c0_15 = arith.constant 0 : index
    %c0_16 = arith.constant 0 : index
    %19 = vector.load %arg8[%c0_15, %c0_16] : memref<1x256xf32, #tpu.memory_space<vmem>>, vector<1x256xf32>
    %20 = vector.broadcast %19 : vector<1x256xf32> to vector<16x256xf32>
    %21 = arith.addf %18, %20 : vector<16x256xf32>
    %22 = vector.extract_strided_slice %21 {offsets = [0, 0], sizes = [16, 128], strides = [1, 1]} : vector<16x256xf32> to vector<16x128xf32>
    %23 = vector.extract_strided_slice %21 {offsets = [0, 128], sizes = [16, 128], strides = [1, 1]} : vector<16x256xf32> to vector<16x128xf32>
    %24 = math.exp %23 : vector<16x128xf32>
    %c0_17 = arith.constant 0 : index
    %c0_18 = arith.constant 0 : index
    %25 = vector.load %arg2[%c0_17, %c0_18] : memref<16x128xf32, #tpu.memory_space<vmem>>, vector<16x128xf32>
    %26 = arith.mulf %24, %25 : vector<16x128xf32>
    %27 = arith.addf %22, %26 : vector<16x128xf32>
    %28 = math.tanh %27 : vector<16x128xf32>
    %cst_19 = arith.constant 1.000000e+00 : f32
    %29 = vector.broadcast %cst_19 : f32 to vector<16x128xf32>
    %30 = arith.mulf %29, %28 : vector<16x128xf32>
    %c0_20 = arith.constant 0 : index
    %c0_21 = arith.constant 0 : index
    %31 = vector.load %arg9[%c0_20, %c0_21] : memref<16x128xf32, #tpu.memory_space<vmem>>, vector<16x128xf32>
    tpu.vector_store %arg9[%c0_20, %c0_21], %30 {strides = array<i32>} : memref<16x128xf32, #tpu.memory_space<vmem>>, vector<16x128xf32>,
    return
  }
  func.func @transform_0(%arg0: i32) -> (i32, i32) {
    %c0_i32 = arith.constant 0 : i32
    %c0_i32_0 = arith.constant 0 : i32
    return %arg0, %c0_i32 : i32, i32
  }
  func.func @transform_1(%arg0: i32) -> (i32, i32) {
    %c0_i32 = arith.constant 0 : i32
    %c0_i32_0 = arith.constant 0 : i32
    return %arg0, %c0_i32 : i32, i32
  }
  func.func @transform_2(%arg0: i32) -> (i32, i32) {
    %c0_i32 = arith.constant 0 : i32
    %c0_i32_0 = arith.constant 0 : i32
    %c0_i32_1 = arith.constant 0 : i32
    return %c0_i32, %c0_i32_0 : i32, i32
  }
  func.func @transform_3(%arg0: i32) -> (i32, i32) {
    %c0_i32 = arith.constant 0 : i32
    %c0_i32_0 = arith.constant 0 : i32
    %c0_i32_1 = arith.constant 0 : i32
    return %c0_i32, %c0_i32_0 : i32, i32
  }
  func.func @transform_4(%arg0: i32) -> (i32, i32) {
    %c0_i32 = arith.constant 0 : i32
    %c0_i32_0 = arith.constant 0 : i32
    %c0_i32_1 = arith.constant 0 : i32
    return %c0_i32, %c0_i32_0 : i32, i32
  }
  func.func @transform_5(%arg0: i32) -> (i32, i32) {
    %c0_i32 = arith.constant 0 : i32
    %c0_i32_0 = arith.constant 0 : i32
    %c0_i32_1 = arith.constant 0 : i32
    return %c0_i32, %c0_i32_0 : i32, i32
  }
  func.func @transform_6(%arg0: i32) -> (i32, i32) {
    %c0_i32 = arith.constant 0 : i32
    %c0_i32_0 = arith.constant 0 : i32
    %c0_i32_1 = arith.constant 0 : i32
    return %c0_i32, %c0_i32_0 : i32, i32
  }
  func.func @transform_7(%arg0: i32) -> (i32, i32) {
    %c0_i32 = arith.constant 0 : i32
    %c0_i32_0 = arith.constant 0 : i32
    %c0_i32_1 = arith.constant 0 : i32
    return %c0_i32, %c0_i32_0 : i32, i32
  }
  func.func @transform_8(%arg0: i32) -> (i32, i32) {
    %c0_i32 = arith.constant 0 : i32
    %c0_i32_0 = arith.constant 0 : i32
    return %arg0, %c0_i32 : i32, i32
  }
}

</mosaic_0001>

<bundles_post_ra>
// kernel: tpu_custom_call.1
= control target key start
LH: loop header
LB: loop body
LE: loop exit
PB: predicated region body
PF: predicated region fallthrough
CT: control target
= control target key end

     0   :  { %13 = vsyncpa [#allocation3], 0  ;;  %s2420_s0 = inlined_call_operand.hbm [shape: bf16[16,128], index: 0, kind: input, shape index: {}]   ;;  %s2421_s1 = inlined_call_operand.hbm [shape: f32[16,128], index: 1, kind: input, shape index: {}]   ;;  %s2422_s2 = inlined_call_operand.hbm [shape: bf16[128,512], index: 2, kind: input, shape index: {}]   ;;  %s2423_s3 = inlined_call_operand.vmem [shape: f32[1,512], index: 3, kind: input, shape index: {}]   ;;  %s2424_s4 = inlined_call_operand.hbm [shape: bf16[512,384], index: 4, kind: input, shape index: {}]   ;;  %s2425_s5 = inlined_call_operand.vmem [shape: f32[1,384], index: 5, kind: input, shape index: {}]   ;;  %s2426_s6 = inlined_call_operand.hbm [shape: bf16[384,256], index: 6, kind: input, shape index: {}]   ;;  %s2427_s7 = inlined_call_operand.vmem [shape: f32[1,256], index: 7, kind: input, shape index: {}]   ;;  %s2428_s8 = inlined_call_operand.hbm [shape: f32[16,128], index: 8, kind: output, shape index: {}]  }
   0x1   :  { %14 = vsyncpa [#allocation6], 0 }
   0x2   :  { %15 = vsyncpa [#allocation9], 0 }
   0x3   :  { %16 = vsyncpa [#allocation4], 0  ;;  %s2293_s27 = smov [#allocation5]  }
   0x4   :  { %s34_s28 = sshll.u32 %s2293_s27, 4  ;;  %s35_s28 = int_to_ptr.vmem [resolvable:$true] %s34_s28 }
   0x5   :  { %s2173_s29 = scalar_lea.vmem %s35_s28, 256  ;;  %p2178_p1 = scmp.lt.s32.totalorder %s35_s28, %s35_s28 }
   0x6   :  { %p2174_p0 = scmp.ne.s32.totalorder %s35_s28, %s2173_s29  ;;  %p2179_p2 = scmp.lt.s32.totalorder %s2173_s29, %s2173_s29 }
   0x8   :  { %p2180_p3 = por %p2179_p2, %p2178_p1 }
   0xa   :  { %p2181_p4 = pnand %p2180_p3, %p2174_p0 }
   0xc   :  { %2184 = shalt.err (!%p2181_p4)
}
   0xd   :  { %s2294_s30 = smov 128   ;;  %s2295_s9 = smov 8  }
   0xe   :  { %40 = dma.hbm_to_vmem [thread:$0]  %s2421_s1, 256, %s35_s28, [#allocation6], %s2294_s30, %s2294_s30, %s2295_s9  }
   0xf   :  { %s2296_s12 = smov [#allocation8]  }
  0x10   :  { %s60_s13 = sshll.u32 %s2296_s12, 4  ;;  %s61_s13 = int_to_ptr.vmem [resolvable:$true] %s60_s13 }
  0x11   :  { %s2193_s14 = scalar_lea.vmem %s61_s13, 12288  ;;  %p2198_p6 = scmp.lt.s32.totalorder %s61_s13, %s61_s13 }
  0x12   :  { %p2194_p5 = scmp.ne.s32.totalorder %s61_s13, %s2193_s14  ;;  %p2199_p7 = scmp.lt.s32.totalorder %s2193_s14, %s2193_s14 }
  0x14   :  { %p2200_p8 = por %p2199_p7, %p2198_p6 }
  0x16   :  { %p2201_p9 = pnand %p2200_p8, %p2194_p5 }
  0x18   :  { %2204 = shalt.err (!%p2201_p9)
}
  0x19   :  { %s2297_s15 = smov 192   ;;  %s2298_s16 = smov 12  }
  0x1a   :  { %66 = dma.hbm_to_vmem [thread:$0]  %s2424_s4, 12288, %s61_s13, [#allocation9], %s2297_s15, %s2297_s15, %s2298_s16  }
  0x1b   :  { %s2299_s19 = smov [#allocation2]  }
  0x1c   :  { %s22_s20 = sshll.u32 %s2299_s19, 4  ;;  %s23_s20 = int_to_ptr.vmem [resolvable:$true] %s22_s20 }
  0x1d   :  { %s2213_s1 = scalar_lea.vmem %s23_s20, 128  ;;  %p2218_p11 = scmp.lt.s32.totalorder %s23_s20, %s23_s20 }
  0x1e   :  { %p2214_p10 = scmp.ne.s32.totalorder %s23_s20, %s2213_s1  ;;  %p2219_p12 = scmp.lt.s32.totalorder %s2213_s1, %s2213_s1 }
  0x20   :  { %p2220_p13 = por %p2219_p12, %p2218_p11 }
  0x22   :  { %p2221_p0 = pnand %p2220_p13, %p2214_p10 }
  0x24   :  { %2224 = shalt.err (!%p2221_p0)
}
  0x25   :  { %s2300_s21 = smov 64   ;;  %s2301_s22 = smov 4  }
  0x26   :  { %28 = dma.hbm_to_vmem [thread:$0]  %s2420_s0, 128, %s23_s20, [#allocation3], %s2300_s21, %s2300_s21, %s2301_s22  }
  0x27   :  { %s2302_s25 = smov [#allocation7]  }
  0x28   :  { %s46_s26 = sshll.u32 %s2302_s25, 4  ;;  %s47_s26 = int_to_ptr.vmem [resolvable:$true] %s46_s26 }
  0x29   :  { %s2233_s4 = scalar_lea.vmem %s47_s26, 4096  ;;  %p2238_p2 = scmp.lt.s32.totalorder %s47_s26, %s47_s26 }
  0x2a   :  { %p2234_p1 = scmp.ne.s32.totalorder %s47_s26, %s2233_s4  ;;  %p2239_p3 = scmp.lt.s32.totalorder %s2233_s4, %s2233_s4 }
  0x2c   :  { %p2240_p4 = por %p2239_p3, %p2238_p2 }
  0x2e   :  { %p2241_p5 = pnand %p2240_p4, %p2234_p1 }
  0x30   :  { %2244 = shalt.err (!%p2241_p5)
}
  0x31   :  { %s2303_s27 = smov 256   ;;  %s2304_s28 = smov 16  }
  0x32   :  { %52 = dma.hbm_to_vmem [thread:$0]  %s2422_s2, 4096, %s47_s26, [#allocation6], %s2303_s27, %s2303_s27, %s2304_s28  }
  0x33   :  { %s2305_s11 = smov [#allocation10]  }
  0x34   :  { %s74_s12 = sshll.u32 %s2305_s11, 4  ;;  %s75_s12 = int_to_ptr.vmem [resolvable:$true] %s74_s12 }
  0x35   :  { %s2253_s0 = scalar_lea.vmem %s75_s12, 6144  ;;  %p2258_p7 = scmp.lt.s32.totalorder %s75_s12, %s75_s12 }
  0x36   :  { %p2254_p6 = scmp.ne.s32.totalorder %s75_s12, %s2253_s0  ;;  %p2259_p8 = scmp.lt.s32.totalorder %s2253_s0, %s2253_s0 }
  0x38   :  { %p2260_p9 = por %p2259_p8, %p2258_p7 }
  0x3a   :  { %p2261_p10 = pnand %p2260_p9, %p2254_p6 }
  0x3c   :  { %2264 = shalt.err (!%p2261_p10)
}
  0x3d   :  { %80 = dma.hbm_to_vmem [thread:$0]  %s2426_s6, 6144, %s75_s12, [#allocation9], %s2294_s30, %s2294_s30, %s2295_s9  }
  0x3e   :  { %2285 = dma.done.wait [#allocation3], 128  }
  0x3f   :  { %2286 = vsyncadd [#allocation3], 4294967168 }
  0x40   :  { %2287 = dma.done.wait [#allocation6], 4352  }
  0x41   :  { %2288 = vsyncadd [#allocation6], 4294962944 }
  0x42   :  { %2289 = dma.done.wait [#allocation9], 18432  }
  0x43   :  { %2290 = vsyncadd [#allocation9], 4294948864  ;;  %v2306_v0 = vmov 0   ;;  %v1908_v1 = vld [vmem:[#allocation7 + $0xe4] ss:$16 sps:$4 sm:$0xff]   ;;  %v1956_v35 = vld [vmem:[#allocation2] sm:$0xff]  }
  0x44   :  { %353 = vmatprep.mubr.bf16.mxu0 %v2306_v0  ;;  %396 = vmatprep.mubr.bf16.mxu1 %v2306_v0  ;;  %v1910_v2 = vld [vmem:[#allocation7 + $0xec] ss:$16 sps:$4 sm:$0xff]   ;;  %v1912_v3 = vld [vmem:[#allocation7 + $0xe0] ss:$16 sps:$4 sm:$0xff]   ;;  %v1913_v4 = vld [vmem:[#allocation7 + $0xe8] ss:$16 sps:$4 sm:$0xff]  }
  0x45   :  { %321 = vmatprep.subr.bf16.mxu0 %v1908_v1  ;;  %364 = vmatprep.subr.bf16.mxu1 %v1910_v2  ;;  %v1914_v5 = vld [vmem:[#allocation7 + $0xc4] ss:$16 sps:$4 sm:$0xff]   ;;  %v1916_v6 = vld [vmem:[#allocation7 + $0xcc] ss:$16 sps:$4 sm:$0xff]   ;;  %v1918_v7 = vld [vmem:[#allocation7 + $0xc0] ss:$16 sps:$4 sm:$0xff]  }
  0x46   :  { %322 = vmatpush1.bf16.msra.mxu0 %v1912_v3  ;;  %365 = vmatpush1.bf16.msra.mxu1 %v1913_v4  ;;  %v1919_v8 = vld [vmem:[#allocation7 + $0xc8] ss:$16 sps:$4 sm:$0xff]   ;;  %v1920_v9 = vld [vmem:[#allocation7 + $0xa4] ss:$16 sps:$4 sm:$0xff]   ;;  %v1922_v10 = vld [vmem:[#allocation7 + $0xac] ss:$16 sps:$4 sm:$0xff]  }
  0x47   :  { %323 = vmatprep.subr.bf16.mxu0 %v1914_v5  ;;  %366 = vmatprep.subr.bf16.mxu1 %v1916_v6  ;;  %v1924_v11 = vld [vmem:[#allocation7 + $0xa0] ss:$16 sps:$4 sm:$0xff]   ;;  %v1925_v12 = vld [vmem:[#allocation7 + $0xa8] ss:$16 sps:$4 sm:$0xff]   ;;  %v1926_v13 = vld [vmem:[#allocation7 + $0x84] ss:$16 sps:$4 sm:$0xff]  }
  0x48   :  { %v1928_v14 = vld [vmem:[#allocation7 + $0x8c] ss:$16 sps:$4 sm:$0xff]   ;;  %v1930_v15 = vld [vmem:[#allocation7 + $0x80] ss:$16 sps:$4 sm:$0xff]   ;;  %v1931_v16 = vld [vmem:[#allocation7 + $0x88] ss:$16 sps:$4 sm:$0xff]  }
  0x49   :  { %v1932_v17 = vld [vmem:[#allocation7 + $0x64] ss:$16 sps:$4 sm:$0xff]   ;;  %v1934_v18 = vld [vmem:[#allocation7 + $0x6c] ss:$16 sps:$4 sm:$0xff]   ;;  %v1936_v19 = vld [vmem:[#allocation7 + $0x60] ss:$16 sps:$4 sm:$0xff]  }
  0x4a   :  { %324 = vmatpush1.bf16.msra.mxu0 %v1918_v7  ;;  %367 = vmatpush1.bf16.msra.mxu1 %v1919_v8  ;;  %v1937_v20 = vld [vmem:[#allocation7 + $0x68] ss:$16 sps:$4 sm:$0xff]   ;;  %v1938_v21 = vld [vmem:[#allocation7 + $0x44] ss:$16 sps:$4 sm:$0xff]   ;;  %v1940_v22 = vld [vmem:[#allocation7 + $0x4c] ss:$16 sps:$4 sm:$0xff]  }
  0x4b   :  { %325 = vmatprep.subr.bf16.mxu0 %v1920_v9  ;;  %368 = vmatprep.subr.bf16.mxu1 %v1922_v10  ;;  %v1942_v23 = vld [vmem:[#allocation7 + $0x40] ss:$16 sps:$4 sm:$0xff]   ;;  %v1943_v24 = vld [vmem:[#allocation7 + $0x48] ss:$16 sps:$4 sm:$0xff]   ;;  %v1944_v25 = vld [vmem:[#allocation7 + $0x24] ss:$16 sps:$4 sm:$0xff]  }
  0x4c   :  { %v1946_v26 = vld [vmem:[#allocation7 + $0x2c] ss:$16 sps:$4 sm:$0xff]   ;;  %v1948_v27 = vld [vmem:[#allocation7 + $0x20] ss:$16 sps:$4 sm:$0xff]   ;;  %v1949_v28 = vld [vmem:[#allocation7 + $0x28] ss:$16 sps:$4 sm:$0xff]  }
  0x4d   :  { %v1950_v29 = vld [vmem:[#allocation7 + $0x4] ss:$16 sps:$4 sm:$0xff]   ;;  %v1952_v30 = vld [vmem:[#allocation7 + $0xc] ss:$16 sps:$4 sm:$0xff]   ;;  %v1954_v31 = vld [vmem:[#allocation7] ss:$16 sps:$4 sm:$0xff]  }
  0x4e   :  { %326 = vmatpush1.bf16.msra.mxu0 %v1924_v11  ;;  %369 = vmatpush1.bf16.msra.mxu1 %v1925_v12  ;;  %v1955_v32 = vld [vmem:[#allocation7 + $0x8] ss:$16 sps:$4 sm:$0xff]   ;;  %v1965_v38 = vld [vmem:[#allocation8 + $0x94] ss:$12 sps:$4 sm:$0xff]   ;;  %v1963_v40 = vld [vmem:[#allocation8 + $0x90] ss:$12 sps:$4 sm:$0xff]  }
  0x4f   :  { %327 = vmatprep.subr.bf16.mxu0 %v1926_v13  ;;  %370 = vmatprep.subr.bf16.mxu1 %v1928_v14  ;;  %v1959_v33 = vld [vmem:[#allocation8 + $0xac] ss:$12 sps:$4 sm:$0xff]   ;;  %v1957_v36 = vld [vmem:[#allocation8 + $0xa8] ss:$12 sps:$4 sm:$0xff]   ;;  %v1966_v41 = vld [vmem:[#allocation8 + $0x210] ss:$12 sps:$4 sm:$0xff]  }
  0x50   :  { %v1962_v34 = vld [vmem:[#allocation8 + $0x22c] ss:$12 sps:$4 sm:$0xff]   ;;  %v1960_v37 = vld [vmem:[#allocation8 + $0x228] ss:$12 sps:$4 sm:$0xff]   ;;  %v1977_v46 = vld [vmem:[#allocation8 + $0x64] ss:$12 sps:$4 sm:$0xff]  }
  0x51   :  { %v1968_v39 = vld [vmem:[#allocation8 + $0x214] ss:$12 sps:$4 sm:$0xff]   ;;  %v1971_v42 = vld [vmem:[#allocation8 + $0x7c] ss:$12 sps:$4 sm:$0xff]   ;;  %v1969_v44 = vld [vmem:[#allocation8 + $0x78] ss:$12 sps:$4 sm:$0xff]  }
  0x52   :  { %328 = vmatpush1.bf16.msra.mxu0 %v1930_v15  ;;  %371 = vmatpush1.bf16.msra.mxu1 %v1931_v16  ;;  %v1974_v43 = vld [vmem:[#allocation8 + $0x1fc] ss:$12 sps:$4 sm:$0xff]   ;;  %v1972_v45 = vld [vmem:[#allocation8 + $0x1f8] ss:$12 sps:$4 sm:$0xff]   ;;  %v1975_v48 = vld [vmem:[#allocation8 + $0x60] ss:$12 sps:$4 sm:$0xff]  }
  0x53   :  { %329 = vmatprep.subr.bf16.mxu0 %v1932_v17  ;;  %372 = vmatprep.subr.bf16.mxu1 %v1934_v18  ;;  %v1980_v47 = vld [vmem:[#allocation8 + $0x1e4] ss:$12 sps:$4 sm:$0xff]   ;;  %v1978_v49 = vld [vmem:[#allocation8 + $0x1e0] ss:$12 sps:$4 sm:$0xff]   ;;  %v1981_v52 = vld [vmem:[#allocation8 + $0x48] ss:$12 sps:$4 sm:$0xff]  }
  0x54   :  { %v1983_v50 = vld [vmem:[#allocation8 + $0x4c] ss:$12 sps:$4 sm:$0xff]   ;;  %v1984_v53 = vld [vmem:[#allocation8 + $0x1c8] ss:$12 sps:$4 sm:$0xff]   ;;  %v1987_v56 = vld [vmem:[#allocation8 + $0x30] ss:$12 sps:$4 sm:$0xff]  }
  0x55   :  { %v1986_v51 = vld [vmem:[#allocation8 + $0x1cc] ss:$12 sps:$4 sm:$0xff]   ;;  %v1989_v54 = vld [vmem:[#allocation8 + $0x34] ss:$12 sps:$4 sm:$0xff]   ;;  %v1990_v57 = vld [vmem:[#allocation8 + $0x1b0] ss:$12 sps:$4 sm:$0xff]  }
  0x56   :  { %330 = vmatpush1.bf16.msra.mxu0 %v1936_v19  ;;  %373 = vmatpush1.bf16.msra.mxu1 %v1937_v20  ;;  %v1992_v55 = vld [vmem:[#allocation8 + $0x1b4] ss:$12 sps:$4 sm:$0xff]   ;;  %v1995_v58 = vld [vmem:[#allocation8 + $0x1c] ss:$12 sps:$4 sm:$0xff]   ;;  %v1993_v60 = vld [vmem:[#allocation8 + $0x18] ss:$12 sps:$4 sm:$0xff]  }
  0x57   :  { %331 = vmatprep.subr.bf16.mxu0 %v1938_v21  ;;  %374 = vmatprep.subr.bf16.mxu1 %v1940_v22  ;;  %v1998_v59 = vld [vmem:[#allocation8 + $0x19c] ss:$12 sps:$4 sm:$0xff]   ;;  %v1996_v61 = vld [vmem:[#allocation8 + $0x198] ss:$12 sps:$4 sm:$0xff]   ;;  %v1999_v1 = vld [vmem:[#allocation8] ss:$12 sps:$4 sm:$0xff]  }
  0x58   :  { %v2001_v62 = vld [vmem:[#allocation8 + $0x4] ss:$12 sps:$4 sm:$0xff]   ;;  %v2002_v2 = vld [vmem:[#allocation8 + $0x180] ss:$12 sps:$4 sm:$0xff]   ;;  %v2005_v5 = vld [vmem:[#allocation8 + $0x168] ss:$12 sps:$4 sm:$0xff]  }
  0x59   :  { %v2004_v63 = vld [vmem:[#allocation8 + $0x184] ss:$12 sps:$4 sm:$0xff]   ;;  %v2007_v3 = vld [vmem:[#allocation8 + $0x16c] ss:$12 sps:$4 sm:$0xff]   ;;  %v2008_v6 = vld [vmem:[#allocation8 + $0x2e8] ss:$12 sps:$4 sm:$0xff]  }
  0x5a   :  { %332 = vmatpush1.bf16.msra.mxu0 %v1942_v23  ;;  %375 = vmatpush1.bf16.msra.mxu1 %v1943_v24  ;;  %v2010_v4 = vld [vmem:[#allocation8 + $0x2ec] ss:$12 sps:$4 sm:$0xff]   ;;  %v2013_v7 = vld [vmem:[#allocation8 + $0x154] ss:$12 sps:$4 sm:$0xff]   ;;  %v2011_v9 = vld [vmem:[#allocation8 + $0x150] ss:$12 sps:$4 sm:$0xff]  }
  0x5b   :  { %333 = vmatprep.subr.bf16.mxu0 %v1944_v25  ;;  %376 = vmatprep.subr.bf16.mxu1 %v1946_v26  ;;  %v2016_v8 = vld [vmem:[#allocation8 + $0x2d4] ss:$12 sps:$4 sm:$0xff]   ;;  %v2014_v10 = vld [vmem:[#allocation8 + $0x2d0] ss:$12 sps:$4 sm:$0xff]   ;;  %v2017_v13 = vld [vmem:[#allocation8 + $0x138] ss:$12 sps:$4 sm:$0xff]  }
  0x5c   :  { %v2019_v11 = vld [vmem:[#allocation8 + $0x13c] ss:$12 sps:$4 sm:$0xff]   ;;  %v2020_v14 = vld [vmem:[#allocation8 + $0x2b8] ss:$12 sps:$4 sm:$0xff]   ;;  %v2023_v17 = vld [vmem:[#allocation8 + $0x120] ss:$12 sps:$4 sm:$0xff]  }
  0x5d   :  { %v2022_v12 = vld [vmem:[#allocation8 + $0x2bc] ss:$12 sps:$4 sm:$0xff]   ;;  %v2025_v15 = vld [vmem:[#allocation8 + $0x124] ss:$12 sps:$4 sm:$0xff]   ;;  %v2026_v18 = vld [vmem:[#allocation8 + $0x2a0] ss:$12 sps:$4 sm:$0xff]  }
  0x5e   :  { %334 = vmatpush1.bf16.msra.mxu0 %v1948_v27  ;;  %377 = vmatpush1.bf16.msra.mxu1 %v1949_v28  ;;  %v2028_v16 = vld [vmem:[#allocation8 + $0x2a4] ss:$12 sps:$4 sm:$0xff]   ;;  %v2031_v19 = vld [vmem:[#allocation8 + $0x10c] ss:$12 sps:$4 sm:$0xff]   ;;  %v2029_v21 = vld [vmem:[#allocation8 + $0x108] ss:$12 sps:$4 sm:$0xff]  }
  0x5f   :  { %335 = vmatprep.subr.bf16.mxu0 %v1950_v29  ;;  %378 = vmatprep.subr.bf16.mxu1 %v1952_v30  ;;  %v2034_v20 = vld [vmem:[#allocation8 + $0x28c] ss:$12 sps:$4 sm:$0xff]   ;;  %v2032_v22 = vld [vmem:[#allocation8 + $0x288] ss:$12 sps:$4 sm:$0xff]   ;;  %v2035_v25 = vld [vmem:[#allocation8 + $0xf0] ss:$12 sps:$4 sm:$0xff]  }
  0x60   :  { %v2037_v23 = vld [vmem:[#allocation8 + $0xf4] ss:$12 sps:$4 sm:$0xff]   ;;  %v2038_v26 = vld [vmem:[#allocation8 + $0x270] ss:$12 sps:$4 sm:$0xff]   ;;  %v2041_v29 = vld [vmem:[#allocation8 + $0xd8] ss:$12 sps:$4 sm:$0xff]  }
  0x61   :  { %v2040_v24 = vld [vmem:[#allocation8 + $0x274] ss:$12 sps:$4 sm:$0xff]   ;;  %v2043_v27 = vld [vmem:[#allocation8 + $0xdc] ss:$12 sps:$4 sm:$0xff]   ;;  %v2044_v30 = vld [vmem:[#allocation8 + $0x258] ss:$12 sps:$4 sm:$0xff]  }
  0x62   :  { %336 = vmatpush1.bf16.msra.mxu0 %v1954_v31  ;;  %379 = vmatpush1.bf16.msra.mxu1 %v1955_v32  ;;  %v2046_v28 = vld [vmem:[#allocation8 + $0x25c] ss:$12 sps:$4 sm:$0xff]   ;;  %v2049_v31 = vld [vmem:[#allocation8 + $0xc4] ss:$12 sps:$4 sm:$0xff]  }
  0x63   :  { %1076 = vmatprep.subr.bf16.mxu0 %v1959_v33  ;;  %1119 = vmatprep.subr.bf16.mxu1 %v1962_v34  ;;  %v2052_v32 = vld [vmem:[#allocation8 + $0x244] ss:$12 sps:$4 sm:$0xff]   ;;  %v2047_v33 = vld [vmem:[#allocation8 + $0xc0] ss:$12 sps:$4 sm:$0xff]  }
  0x64   :  { %v2050_v34 = vld [vmem:[#allocation8 + $0x240] ss:$12 sps:$4 sm:$0xff]  }
  0x65   :  { %354 = vmatmul.mubr.bf16.vlgmr.msra.gmra.mxu0 %v1956_v35  ;;  %397 = vmatmul.mubr.bf16.vlgmr.msra.gmra.mxu1 %v1956_v35  ;;  %v2053_v35 = vld [vmem:[#allocation8 + $0x170] ss:$12 sps:$4 sm:$0xff]  }
  0x66   :  { %1077 = vmatpush1.bf16.msra.mxu0 %v1957_v36  ;;  %1120 = vmatpush1.bf16.msra.mxu1 %v1960_v37  ;;  %v2054_v36 = vld [vmem:[#allocation8 + $0x2f0] ss:$12 sps:$4 sm:$0xff]   ;;  %v135_v37 = vlaneseq }
  0x67   :  { %1078 = vmatprep.subr.bf16.mxu0 %v1965_v38  ;;  %1121 = vmatprep.subr.bf16.mxu1 %v1968_v39 }
  0x68   :  { %v2376_v38 = vshrl.u32 %v135_v37, 7  ;;  %v2079_v37 = vld [vmem:[#allocation8 + $0x20] ss:$12 sps:$4 sm:$0xff]  }
  0x6a   :  { %1079 = vmatpush1.bf16.msra.mxu0 %v1963_v40  ;;  %1122 = vmatpush1.bf16.msra.mxu1 %v1966_v41  ;;  %v2379_v39 = vsub.s32 1, %v2376_v38  ;;  %v149_v40 = vsub.s32 3, %v2376_v38  ;;  %v2383_v41 = vsub.s32 0, %v2376_v38 }
  0x6b   :  { %1080 = vmatprep.subr.bf16.mxu0 %v1971_v42  ;;  %1123 = vmatprep.subr.bf16.mxu1 %v1974_v43  ;;  %v145_v42 = vsub.s32 2, %v2376_v38  ;;  %v133_v43 = vld [vmem:[%s2423_s3] sm:$0xf] }
  0x6e   :  { %1081 = vmatpush1.bf16.msra.mxu0 %v1969_v44  ;;  %1124 = vmatpush1.bf16.msra.mxu1 %v1972_v45 }
  0x6f   :  { %1082 = vmatprep.subr.bf16.mxu0 %v1977_v46  ;;  %1125 = vmatprep.subr.bf16.mxu1 %v1980_v47  ;;  %v142_v46 = vrot.slane %v133_v43, %v2379_v39  ;;  %v150_v47 = vrot.slane %v133_v43, %v149_v40  ;;  %v2080_v40 = vld [vmem:[#allocation8 + $0x1a0] ss:$12 sps:$4 sm:$0xff]  }
  0x72   :  { %1083 = vmatpush1.bf16.msra.mxu0 %v1975_v48  ;;  %1126 = vmatpush1.bf16.msra.mxu1 %v1978_v49  ;;  %v138_v48 = vrot.slane %v133_v43, %v2383_v41  ;;  %v146_v49 = vrot.slane %v133_v43, %v145_v42  ;;  %v2081_v43 = vld [vmem:[#allocation8 + $0xc8] ss:$12 sps:$4 sm:$0xff]  }
  0x73   :  { %1084 = vmatprep.subr.bf16.mxu0 %v1983_v50  ;;  %1127 = vmatprep.subr.bf16.mxu1 %v1986_v51 }
  0x76   :  { %1085 = vmatpush1.bf16.msra.mxu0 %v1981_v52  ;;  %1128 = vmatpush1.bf16.msra.mxu1 %v1984_v53 }
  0x77   :  { %1086 = vmatprep.subr.bf16.mxu0 %v1989_v54  ;;  %1129 = vmatprep.subr.bf16.mxu1 %v1992_v55 }
  0x7a   :  { %1087 = vmatpush1.bf16.msra.mxu0 %v1987_v56  ;;  %1130 = vmatpush1.bf16.msra.mxu1 %v1990_v57 }
  0x7b   :  { %1088 = vmatprep.subr.bf16.mxu0 %v1995_v58  ;;  %1131 = vmatprep.subr.bf16.mxu1 %v1998_v59 }
  0x7e   :  { %1089 = vmatpush1.bf16.msra.mxu0 %v1993_v60  ;;  %1132 = vmatpush1.bf16.msra.mxu1 %v1996_v61 }
  0x7f   :  { %1090 = vmatprep.subr.bf16.mxu0 %v2001_v62  ;;  %1133 = vmatprep.subr.bf16.mxu1 %v2004_v63 }
  0x82   :  { %1091 = vmatpush1.bf16.msra.mxu0 %v1999_v1  ;;  %1134 = vmatpush1.bf16.msra.mxu1 %v2002_v2 }
  0x83   :  { %1092 = vmatprep.subr.bf16.mxu0 %v2007_v3  ;;  %1135 = vmatprep.subr.bf16.mxu1 %v2010_v4 }
  0x86   :  { %1093 = vmatpush2.bf16.msra.mxu0 %v2005_v5  ;;  %1136 = vmatpush2.bf16.msra.mxu1 %v2008_v6 }
  0x87   :  { %1094 = vmatprep.subr.bf16.mxu0 %v2013_v7  ;;  %1137 = vmatprep.subr.bf16.mxu1 %v2016_v8 }
  0x8a   :  { %1095 = vmatpush2.bf16.msra.mxu0 %v2011_v9  ;;  %1138 = vmatpush2.bf16.msra.mxu1 %v2014_v10 }
  0x8b   :  { %1096 = vmatprep.subr.bf16.mxu0 %v2019_v11  ;;  %1139 = vmatprep.subr.bf16.mxu1 %v2022_v12  ;;  %v2055_v11 = vld [vmem:[#allocation8 + $0xb0] ss:$12 sps:$4 sm:$0xff]  }
  0x8c   :  { %v2056_v12 = vld [vmem:[#allocation8 + $0x230] ss:$12 sps:$4 sm:$0xff]  }
  0x8e   :  { %1097 = vmatpush2.bf16.msra.mxu0 %v2017_v13  ;;  %1140 = vmatpush2.bf16.msra.mxu1 %v2020_v14 }
  0x8f   :  { %1098 = vmatprep.subr.bf16.mxu0 %v2025_v15  ;;  %1141 = vmatprep.subr.bf16.mxu1 %v2028_v16  ;;  %v2057_v15 = vld [vmem:[#allocation8 + $0x158] ss:$12 sps:$4 sm:$0xff]  }
  0x90   :  { %v2058_v16 = vld [vmem:[#allocation8 + $0x2d8] ss:$12 sps:$4 sm:$0xff]  }
  0x92   :  { %1099 = vmatpush2.bf16.msra.mxu0 %v2023_v17  ;;  %1142 = vmatpush2.bf16.msra.mxu1 %v2026_v18  ;;  %v2059_v17 = vld [vmem:[#allocation8 + $0x98] ss:$12 sps:$4 sm:$0xff]  }
  0x93   :  { %1100 = vmatprep.subr.bf16.mxu0 %v2031_v19  ;;  %1143 = vmatprep.subr.bf16.mxu1 %v2034_v20  ;;  %v2060_v18 = vld [vmem:[#allocation8 + $0x218] ss:$12 sps:$4 sm:$0xff]   ;;  %v2061_v19 = vld [vmem:[#allocation8 + $0x140] ss:$12 sps:$4 sm:$0xff]  }
  0x94   :  { %v2062_v20 = vld [vmem:[#allocation8 + $0x2c0] ss:$12 sps:$4 sm:$0xff]  }
  0x96   :  { %1101 = vmatpush2.bf16.msra.mxu0 %v2029_v21  ;;  %1144 = vmatpush2.bf16.msra.mxu1 %v2032_v22  ;;  %v2063_v21 = vld [vmem:[#allocation8 + $0x80] ss:$12 sps:$4 sm:$0xff]  }
  0x97   :  { %1102 = vmatprep.subr.bf16.mxu0 %v2037_v23  ;;  %1145 = vmatprep.subr.bf16.mxu1 %v2040_v24  ;;  %v2064_v22 = vld [vmem:[#allocation8 + $0x200] ss:$12 sps:$4 sm:$0xff]   ;;  %v2065_v23 = vld [vmem:[#allocation8 + $0x128] ss:$12 sps:$4 sm:$0xff]  }
  0x98   :  { %v2066_v24 = vld [vmem:[#allocation8 + $0x2a8] ss:$12 sps:$4 sm:$0xff]  }
  0x9a   :  { %1103 = vmatpush2.bf16.msra.mxu0 %v2035_v25  ;;  %1146 = vmatpush2.bf16.msra.mxu1 %v2038_v26  ;;  %v2067_v25 = vld [vmem:[#allocation8 + $0x68] ss:$12 sps:$4 sm:$0xff]  }
  0x9b   :  { %1104 = vmatprep.subr.bf16.mxu0 %v2043_v27  ;;  %1147 = vmatprep.subr.bf16.mxu1 %v2046_v28  ;;  %v2068_v26 = vld [vmem:[#allocation8 + $0x1e8] ss:$12 sps:$4 sm:$0xff]   ;;  %v2069_v27 = vld [vmem:[#allocation8 + $0x110] ss:$12 sps:$4 sm:$0xff]  }
  0x9c   :  { %v2070_v28 = vld [vmem:[#allocation8 + $0x290] ss:$12 sps:$4 sm:$0xff]  }
  0x9e   :  { %1105 = vmatpush2.bf16.msra.mxu0 %v2041_v29  ;;  %1148 = vmatpush2.bf16.msra.mxu1 %v2044_v30  ;;  %v2071_v29 = vld [vmem:[#allocation8 + $0x50] ss:$12 sps:$4 sm:$0xff]  }
  0x9f   :  { %1106 = vmatprep.subr.bf16.mxu0 %v2049_v31  ;;  %1149 = vmatprep.subr.bf16.mxu1 %v2052_v32  ;;  %v2072_v30 = vld [vmem:[#allocation8 + $0x1d0] ss:$12 sps:$4 sm:$0xff]   ;;  %v2073_v31 = vld [vmem:[#allocation8 + $0xf8] ss:$12 sps:$4 sm:$0xff]  }
  0xa0   :  { %v2074_v32 = vld [vmem:[#allocation8 + $0x278] ss:$12 sps:$4 sm:$0xff]  }
  0xa2   :  { %1107 = vmatpush2.bf16.msra.mxu0 %v2047_v33  ;;  %1150 = vmatpush2.bf16.msra.mxu1 %v2050_v34  ;;  %v2075_v33 = vld [vmem:[#allocation8 + $0x38] ss:$12 sps:$4 sm:$0xff]  }
  0xa3   :  { %1849 = vmatprep.subr.bf16.mxu0 %v2053_v35  ;;  %1871 = vmatprep.subr.bf16.mxu1 %v2054_v36  ;;  %v2076_v34 = vld [vmem:[#allocation8 + $0x1b8] ss:$12 sps:$4 sm:$0xff]   ;;  %v2077_v35 = vld [vmem:[#allocation8 + $0xe0] ss:$12 sps:$4 sm:$0xff]  }
  0xa4   :  { %v2078_v36 = vld [vmem:[#allocation8 + $0x260] ss:$12 sps:$4 sm:$0xff]  }
 0x125   :  { %v355_v44 = vpop.f32.mrf.mxu0  ;;  %v398_v45 = vpop.f32.mrf.mxu1 }
 0x126   :  { %v356_v58 = vadd.f32 %v355_v44, %v138_v48  ;;  %v399_v59 = vadd.f32 %v398_v45, %v146_v49  ;;  %v2082_v44 = vld [vmem:[#allocation8 + $0x248] ss:$12 sps:$4 sm:$0xff]  }
 0x127   :  { %v357_v50 = vpop.f32.mrf.mxu0  ;;  %v400_v51 = vpop.f32.mrf.mxu1  ;;  %v2083_v45 = vld [vmem:[#allocation8 + $0x8] ss:$12 sps:$4 sm:$0xff]  }
 0x128   :  { %v358_v54 = vadd.f32 %v357_v50, %v142_v46  ;;  %v401_v55 = vadd.f32 %v400_v51, %v150_v47  ;;  %v407_v7 = vmax.f32 %v356_v58, 0.0  ;;  %v409_v8 = vmax.f32 %v399_v59, 0.0  ;;  %v2088_v50 = vld [vmem:[#allocation10 + $0x60] ss:$8 sps:$4 sm:$0xff]   ;;  %v2093_v51 = vld [vmem:[#allocation10 + $0x54] ss:$8 sps:$4 sm:$0xff]  }
 0x129   :  { %v359_v52 = vpop.f32.mrf.mxu0  ;;  %v402_v53 = vpop.f32.mrf.mxu1  ;;  %v2100_v58 = vld [vmem:[#allocation10 + $0x20] ss:$8 sps:$4 sm:$0xff]   ;;  %v2105_v59 = vld [vmem:[#allocation10 + $0x14] ss:$8 sps:$4 sm:$0xff]  }
 0x12a   :  { %v360_v56 = vadd.f32 %v359_v52, %v138_v48  ;;  %v403_v57 = vadd.f32 %v402_v53, %v146_v49  ;;  %v408_v3 = vmax.f32 %v358_v54, 0.0  ;;  %v410_v4 = vmax.f32 %v401_v55, 0.0  ;;  %v2085_v48 = vld [vmem:[#allocation10 + $0x70] ss:$8 sps:$4 sm:$0xff]   ;;  %v2090_v49 = vld [vmem:[#allocation10 + $0x64] ss:$8 sps:$4 sm:$0xff]  }
 0x12b   :  { %v361_v60 = vpop.f32.mrf.mxu0  ;;  %v404_v61 = vpop.f32.mrf.mxu1  ;;  %v2091_v52 = vld [vmem:[#allocation10 + $0x50] ss:$8 sps:$4 sm:$0xff]   ;;  %v2096_v53 = vld [vmem:[#allocation10 + $0x44] ss:$8 sps:$4 sm:$0xff]   ;;  %v2094_v54 = vld [vmem:[#allocation10 + $0x40] ss:$8 sps:$4 sm:$0xff]  }
 0x12c   :  { %v362_v62 = vadd.f32 %v361_v60, %v142_v46  ;;  %v405_v63 = vadd.f32 %v404_v61, %v150_v47  ;;  %v411_v1 = vmax.f32 %v360_v56, 0.0  ;;  %v413_v2 = vmax.f32 %v403_v57, 0.0  ;;  %v2084_v46 = vld [vmem:[#allocation8 + $0x188] ss:$12 sps:$4 sm:$0xff]   ;;  %v2097_v56 = vld [vmem:[#allocation10 + $0x30] ss:$8 sps:$4 sm:$0xff]  }
 0x12d   :  { %v2087_v47 = vld [vmem:[#allocation10 + $0x74] ss:$8 sps:$4 sm:$0xff]   ;;  %v2102_v57 = vld [vmem:[#allocation10 + $0x24] ss:$8 sps:$4 sm:$0xff]   ;;  %v2106_v61 = vld [vmem:[#allocation10] ss:$8 sps:$4 sm:$0xff]  }
 0x12e   :  { %v412_v5 = vmax.f32 %v362_v62, 0.0  ;;  %v414_v6 = vmax.f32 %v405_v63, 0.0  ;;  %v2393_v13 = vpack.c.bf16 %v411_v1, %v407_v7  ;;  %v2395_v14 = vpack.c.bf16 %v413_v2, %v409_v8  ;;  %v2099_v55 = vld [vmem:[#allocation10 + $0x34] ss:$8 sps:$4 sm:$0xff]   ;;  %v2108_v60 = vld [vmem:[#allocation10 + $0x4] ss:$8 sps:$4 sm:$0xff]  }
 0x12f   :  { %v2111_v62 = vld [vmem:[#allocation10 + $0xf4] ss:$8 sps:$4 sm:$0xff]   ;;  %v2109_v63 = vld [vmem:[#allocation10 + $0xf0] ss:$8 sps:$4 sm:$0xff]   ;;  %v2114_v1 = vld [vmem:[#allocation10 + $0xe4] ss:$8 sps:$4 sm:$0xff]  }
 0x130   :  { %v416_v9 = vpack.c.bf16 %v412_v5, %v408_v3  ;;  %v418_v10 = vpack.c.bf16 %v414_v6, %v410_v4  ;;  %v2112_v2 = vld [vmem:[#allocation10 + $0xe0] ss:$8 sps:$4 sm:$0xff]   ;;  %v2117_v3 = vld [vmem:[#allocation10 + $0xd4] ss:$8 sps:$4 sm:$0xff]   ;;  %v2115_v4 = vld [vmem:[#allocation10 + $0xd0] ss:$8 sps:$4 sm:$0xff]  }
 0x131   :  { %v2120_v5 = vld [vmem:[#allocation10 + $0xc4] ss:$8 sps:$4 sm:$0xff]   ;;  %v2118_v6 = vld [vmem:[#allocation10 + $0xc0] ss:$8 sps:$4 sm:$0xff]   ;;  %v2123_v7 = vld [vmem:[#allocation10 + $0xb4] ss:$8 sps:$4 sm:$0xff]  }
 0x132   :  { %1108 = vmatprep.mubr.bf16.mxu0 %v416_v9  ;;  %1151 = vmatprep.mubr.bf16.mxu1 %v418_v10  ;;  %v2121_v8 = vld [vmem:[#allocation10 + $0xb0] ss:$8 sps:$4 sm:$0xff]  }
 0x133   :  { %1109 = vmatmul.mubr.bf16.vlgmr.msra.gmra.mxu0 %v2393_v13  ;;  %1152 = vmatmul.mubr.bf16.vlgmr.msra.gmra.mxu1 %v2395_v14 }
 0x134   :  { %1850 = vmatpush3.bf16.msra.mxu0 %v2055_v11  ;;  %1872 = vmatpush3.bf16.msra.mxu1 %v2056_v12  ;;  %v2133_v11 = vld [vmem:[#allocation10 + $0x170] ss:$8 sps:$4 sm:$0xff]   ;;  %v2138_v12 = vld [vmem:[#allocation10 + $0x164] ss:$8 sps:$4 sm:$0xff]  }
 0x135   :  { %1194 = vmatprep.mubr.bf16.mxu0 %v416_v9  ;;  %1235 = vmatprep.mubr.bf16.mxu1 %v418_v10  ;;  %v2126_v9 = vld [vmem:[#allocation10 + $0xa4] ss:$8 sps:$4 sm:$0xff]   ;;  %v2135_v10 = vld [vmem:[#allocation10 + $0x174] ss:$8 sps:$4 sm:$0xff]  }
 0x136   :  { %1851 = vmatprep.subr.bf16.mxu0 %v2057_v15  ;;  %1873 = vmatprep.subr.bf16.mxu1 %v2058_v16  ;;  %v2136_v15 = vld [vmem:[#allocation10 + $0x160] ss:$8 sps:$4 sm:$0xff]   ;;  %v2141_v16 = vld [vmem:[#allocation10 + $0x154] ss:$8 sps:$4 sm:$0xff]  }
 0x138   :  { %1852 = vmatpush3.bf16.msra.mxu0 %v2059_v17  ;;  %1874 = vmatpush3.bf16.msra.mxu1 %v2060_v18  ;;  %v2127_v17 = vld [vmem:[#allocation10 + $0x90] ss:$8 sps:$4 sm:$0xff]   ;;  %v2132_v18 = vld [vmem:[#allocation10 + $0x84] ss:$8 sps:$4 sm:$0xff]  }
 0x139   :  { %1853 = vmatprep.subr.bf16.mxu0 %v2061_v19  ;;  %1875 = vmatprep.subr.bf16.mxu1 %v2062_v20  ;;  %v2139_v19 = vld [vmem:[#allocation10 + $0x150] ss:$8 sps:$4 sm:$0xff]   ;;  %v2144_v20 = vld [vmem:[#allocation10 + $0x144] ss:$8 sps:$4 sm:$0xff]  }
 0x13c   :  { %1854 = vmatpush3.bf16.msra.mxu0 %v2063_v21  ;;  %1876 = vmatpush3.bf16.msra.mxu1 %v2064_v22  ;;  %v2130_v21 = vld [vmem:[#allocation10 + $0x80] ss:$8 sps:$4 sm:$0xff]  }
 0x13d   :  { %1855 = vmatprep.subr.bf16.mxu0 %v2065_v23  ;;  %1877 = vmatprep.subr.bf16.mxu1 %v2066_v24  ;;  %v2142_v22 = vld [vmem:[#allocation10 + $0x140] ss:$8 sps:$4 sm:$0xff]   ;;  %v2147_v23 = vld [vmem:[#allocation10 + $0x134] ss:$8 sps:$4 sm:$0xff]   ;;  %v2145_v24 = vld [vmem:[#allocation10 + $0x130] ss:$8 sps:$4 sm:$0xff]  }
 0x140   :  { %1856 = vmatpush3.bf16.msra.mxu0 %v2067_v25  ;;  %1878 = vmatpush3.bf16.msra.mxu1 %v2068_v26  ;;  %v2150_v25 = vld [vmem:[#allocation10 + $0x124] ss:$8 sps:$4 sm:$0xff]   ;;  %v2148_v26 = vld [vmem:[#allocation10 + $0x120] ss:$8 sps:$4 sm:$0xff]  }
 0x141   :  { %1857 = vmatprep.subr.bf16.mxu0 %v2069_v27  ;;  %1879 = vmatprep.subr.bf16.mxu1 %v2070_v28  ;;  %v2153_v27 = vld [vmem:[#allocation10 + $0x114] ss:$8 sps:$4 sm:$0xff]   ;;  %v2151_v28 = vld [vmem:[#allocation10 + $0x110] ss:$8 sps:$4 sm:$0xff]  }
 0x144   :  { %1858 = vmatpush3.bf16.msra.mxu0 %v2071_v29  ;;  %1880 = vmatpush3.bf16.msra.mxu1 %v2072_v30  ;;  %v2156_v29 = vld [vmem:[#allocation10 + $0x104] ss:$8 sps:$4 sm:$0xff]   ;;  %v2154_v30 = vld [vmem:[#allocation10 + $0x100] ss:$8 sps:$4 sm:$0xff]  }
 0x145   :  { %1859 = vmatprep.subr.bf16.mxu0 %v2073_v31  ;;  %1881 = vmatprep.subr.bf16.mxu1 %v2074_v32  ;;  %v547_v31 = vld [vmem:[%s2425_s5] sm:$0x7] }
 0x146   :  { %v556_v32 = vrot.slane %v547_v31, %v2379_v39 }
 0x148   :  { %1860 = vmatpush3.bf16.msra.mxu0 %v2075_v33  ;;  %1882 = vmatpush3.bf16.msra.mxu1 %v2076_v34  ;;  %v552_v33 = vrot.slane %v547_v31, %v2383_v41 }
 0x149   :  { %1861 = vmatprep.subr.bf16.mxu0 %v2077_v35  ;;  %1883 = vmatprep.subr.bf16.mxu1 %v2078_v36 }
 0x14c   :  { %1862 = vmatpush3.bf16.msra.mxu0 %v2079_v37  ;;  %1884 = vmatpush3.bf16.msra.mxu1 %v2080_v40 }
 0x14d   :  { %1863 = vmatprep.subr.bf16.mxu0 %v2081_v43  ;;  %1885 = vmatprep.subr.bf16.mxu1 %v2082_v44 }
 0x150   :  { %1864 = vmatpush3.bf16.msra.mxu0 %v2083_v45  ;;  %1886 = vmatpush3.bf16.msra.mxu1 %v2084_v46 }
 0x151   :  { %1553 = vmatprep.subr.bf16.mxu0 %v2087_v47  ;;  %1596 = vmatprep.subr.bf16.mxu1 %v2135_v10 }
 0x153   :  { %1195 = vmatmul.mubr.bf16.vlgmr.msra.gmra.mxu0 %v2393_v13  ;;  %1236 = vmatmul.mubr.bf16.vlgmr.msra.gmra.mxu1 %v2395_v14  ;;  %v2124_v13 = vld [vmem:[#allocation10 + $0xa0] ss:$8 sps:$4 sm:$0xff]   ;;  %v2129_v14 = vld [vmem:[#allocation10 + $0x94] ss:$8 sps:$4 sm:$0xff]  }
 0x154   :  { %1554 = vmatpush1.bf16.msra.mxu0 %v2085_v48  ;;  %1628 = vmatprep.mubr.bf16.mxu1 %v2306_v0  ;;  %v2103_v0 = vld [vmem:[#allocation10 + $0x10] ss:$8 sps:$4 sm:$0xff]  }
 0x155   :  { %1555 = vmatprep.subr.bf16.mxu0 %v2090_v49  ;;  %1597 = vmatpush1.bf16.msra.mxu1 %v2133_v11 }
 0x156   :  { %1598 = vmatprep.subr.bf16.mxu1 %v2138_v12 }
 0x158   :  { %1556 = vmatpush1.bf16.msra.mxu0 %v2088_v50 }
 0x159   :  { %1557 = vmatprep.subr.bf16.mxu0 %v2093_v51  ;;  %1599 = vmatpush1.bf16.msra.mxu1 %v2136_v15 }
 0x15a   :  { %1600 = vmatprep.subr.bf16.mxu1 %v2141_v16  ;;  %v1301_v16 = vld [vmem:[%s2427_s7] sm:$0x3]  ;;  %s2307_s7 = smov [#allocation11]  }
 0x15b   :  { %s1658_s17 = sshll.u32 %s2307_s7, 4  ;;  %s1659_s17 = int_to_ptr.vmem [resolvable:$true] %s1658_s17 }
 0x15c   :  { %1558 = vmatpush1.bf16.msra.mxu0 %v2091_v52  ;;  %s2265_s18 = scalar_lea.vmem %s1659_s17, 256  ;;  %p2270_p12 = scmp.lt.s32.totalorder %s1659_s17, %s1659_s17 }
 0x15d   :  { %1559 = vmatprep.subr.bf16.mxu0 %v2096_v53  ;;  %1601 = vmatpush1.bf16.msra.mxu1 %v2139_v19  ;;  %p2266_p11 = scmp.ne.s32.totalorder %s1659_s17, %s2265_s18  ;;  %p2271_p13 = scmp.lt.s32.totalorder %s2265_s18, %s2265_s18 }
 0x15e   :  { %1602 = vmatprep.subr.bf16.mxu1 %v2144_v20 }
 0x15f   :  { %p2272_p0 = por %p2271_p13, %p2270_p12 }
 0x160   :  { %1560 = vmatpush1.bf16.msra.mxu0 %v2094_v54 }
 0x161   :  { %1561 = vmatprep.subr.bf16.mxu0 %v2099_v55  ;;  %1603 = vmatpush1.bf16.msra.mxu1 %v2142_v22  ;;  %p2273_p1 = pnand %p2272_p0, %p2266_p11 }
 0x162   :  { %1604 = vmatprep.subr.bf16.mxu1 %v2147_v23 }
 0x164   :  { %1562 = vmatpush1.bf16.msra.mxu0 %v2097_v56 }
 0x165   :  { %1563 = vmatprep.subr.bf16.mxu0 %v2102_v57  ;;  %1605 = vmatpush1.bf16.msra.mxu1 %v2145_v24 }
 0x166   :  { %1606 = vmatprep.subr.bf16.mxu1 %v2150_v25 }
 0x168   :  { %1564 = vmatpush1.bf16.msra.mxu0 %v2100_v58 }
 0x169   :  { %1565 = vmatprep.subr.bf16.mxu0 %v2105_v59  ;;  %1607 = vmatpush1.bf16.msra.mxu1 %v2148_v26 }
 0x16a   :  { %1608 = vmatprep.subr.bf16.mxu1 %v2153_v27 }
 0x16c   :  { %1566 = vmatpush1.bf16.msra.mxu0 %v2103_v0 }
 0x16d   :  { %1567 = vmatprep.subr.bf16.mxu0 %v2108_v60  ;;  %1609 = vmatpush1.bf16.msra.mxu1 %v2151_v28 }
 0x16e   :  { %1610 = vmatprep.subr.bf16.mxu1 %v2156_v29 }
 0x170   :  { %1568 = vmatpush1.bf16.msra.mxu0 %v2106_v61  ;;  %v560_v61 = vrot.slane %v547_v31, %v145_v42  ;;  %v1643_v31 = vld [vmem:[#allocation5] sm:$0xff] }
 0x171   :  { %1569 = vmatprep.subr.bf16.mxu0 %v2111_v62  ;;  %1611 = vmatpush1.bf16.msra.mxu1 %v2154_v30  ;;  %v1306_v30 = vrot.slane %v1301_v16, %v2383_v41 }
 0x174   :  { %1570 = vmatpush2.bf16.msra.mxu0 %v2109_v63 }
 0x175   :  { %1571 = vmatprep.subr.bf16.mxu0 %v2114_v1 }
 0x178   :  { %1572 = vmatpush2.bf16.msra.mxu0 %v2112_v2 }
 0x179   :  { %1573 = vmatprep.subr.bf16.mxu0 %v2117_v3 }
 0x17c   :  { %1574 = vmatpush2.bf16.msra.mxu0 %v2115_v4 }
 0x17d   :  { %1575 = vmatprep.subr.bf16.mxu0 %v2120_v5 }
 0x180   :  { %1576 = vmatpush2.bf16.msra.mxu0 %v2118_v6 }
 0x181   :  { %1577 = vmatprep.subr.bf16.mxu0 %v2123_v7 }
 0x184   :  { %1578 = vmatpush2.bf16.msra.mxu0 %v2121_v8 }
 0x185   :  { %1579 = vmatprep.subr.bf16.mxu0 %v2126_v9 }
 0x188   :  { %1580 = vmatpush2.bf16.msra.mxu0 %v2124_v13 }
 0x189   :  { %1581 = vmatprep.subr.bf16.mxu0 %v2129_v14 }
 0x18c   :  { %1582 = vmatpush2.bf16.msra.mxu0 %v2127_v17  ;;  %v1310_v17 = vrot.slane %v1301_v16, %v2379_v39 }
 0x18d   :  { %1583 = vmatprep.subr.bf16.mxu0 %v2132_v18 }
 0x190   :  { %1584 = vmatpush2.bf16.msra.mxu0 %v2130_v21 }
 0x1f3   :  { %v1110_v34 = vpop.f32.mrf.mxu0  ;;  %v1153_v35 = vpop.f32.mrf.mxu1 }
 0x1f4   :  { %v1111_v43 = vadd.f32 %v1110_v34, %v552_v33 }
 0x1f5   :  { %v1112_v36 = vpop.f32.mrf.mxu0  ;;  %v1155_v37 = vpop.f32.mrf.mxu1 }
 0x1f6   :  { %v1113_v40 = vadd.f32 %v1112_v36, %v556_v32  ;;  %v1154_v51 = vadd.f32 %v1153_v35, %v1111_v43  ;;  %v1644_v35 = vld [vmem:[#allocation5 + $0x8] sm:$0xff] }
 0x1f7   :  { %v1114_v44 = vpop.f32.mrf.mxu0  ;;  %v1157_v45 = vpop.f32.mrf.mxu1 }
 0x1f8   :  { %v1115_v46 = vadd.f32 %v1114_v44, %v552_v33  ;;  %v1156_v48 = vadd.f32 %v1155_v37, %v1113_v40  ;;  %v1244_v57 = vmax.f32 %v1154_v51, 0.0 }
 0x1f9   :  { %v1116_v47 = vpop.f32.mrf.mxu0  ;;  %v1159_v52 = vpop.f32.mrf.mxu1 }
 0x1fa   :  { %v1158_v49 = vadd.f32 %v1157_v45, %v1115_v46  ;;  %v1117_v50 = vadd.f32 %v1116_v47, %v556_v32  ;;  %v1245_v55 = vmax.f32 %v1156_v48, 0.0 }
 0x1fc   :  { %v1160_v53 = vadd.f32 %v1159_v52, %v1117_v50  ;;  %v1247_v54 = vmax.f32 %v1158_v49, 0.0 }
 0x1fe   :  { %v1248_v56 = vmax.f32 %v1160_v53, 0.0  ;;  %v1250_v59 = vpack.c.bf16 %v1247_v54, %v1244_v57 }
 0x200   :  { %v1251_v58 = vpack.c.bf16 %v1248_v56, %v1245_v55 }
 0x202   :  { %1585 = vmatprep.mubr.bf16.mxu0 %v1251_v58 }
 0x203   :  { %1586 = vmatmul.mubr.bf16.vlgmr.msra.gmra.mxu0 %v1250_v59 }
 0x213   :  { %v1865_v0 = vpop.f32.mrf.mxu0  ;;  %v1887_v60 = vpop.f32.mrf.mxu1 }
 0x215   :  { %v1866_v62 = vpop.f32.mrf.mxu0  ;;  %v1888_v63 = vpop.f32.mrf.mxu1 }
 0x216   :  { %v1867_v1 = vadd.f32 %v1866_v62, %v1865_v0  ;;  %v1889_v7 = vadd.f32 %v1888_v63, %v1887_v60 }
 0x217   :  { %v1868_v2 = vpop.f32.mrf.mxu0  ;;  %v1890_v3 = vpop.f32.mrf.mxu1 }
 0x218   :  { %v1197_v4 = vadd.f32 %v1867_v1, %v560_v61 }
 0x219   :  { %v1869_v5 = vpop.f32.mrf.mxu0  ;;  %v1891_v6 = vpop.f32.mrf.mxu1 }
 0x21a   :  { %v1870_v8 = vadd.f32 %v1869_v5, %v1868_v2  ;;  %v1238_v9 = vadd.f32 %v1889_v7, %v1197_v4  ;;  %v1892_v11 = vadd.f32 %v1891_v6, %v1890_v3 }
 0x21c   :  { %v1200_v10 = vadd.f32 %v1870_v8, %v560_v61  ;;  %v1246_v13 = vmax.f32 %v1238_v9, 0.0 }
 0x21e   :  { %v1241_v12 = vadd.f32 %v1892_v11, %v1200_v10 }
 0x220   :  { %v1249_v14 = vmax.f32 %v1241_v12, 0.0 }
 0x222   :  { %v1252_v15 = vpack.c.bf16 %v1249_v14, %v1246_v13 }
 0x224   :  { %1629 = vmatmul.mubr.bf16.vlgmr.msra.gmra.mxu1 %v1252_v15 }
 0x2c3   :  { %v1587_v38 = vpop.f32.mrf.mxu0 }
 0x2c4   :  { %v1588_v32 = vadd.f32 %v1587_v38, %v1306_v30 }
 0x2c5   :  { %v1589_v42 = vpop.f32.mrf.mxu0 }
 0x2c6   :  { %v1590_v20 = vadd.f32 %v1589_v42, %v1310_v17 }
 0x2c7   :  { %v1591_v18 = vpop.f32.mrf.mxu0 }
 0x2c8   :  { %v1592_v36 = vadd.f32 %v1591_v18, %v1306_v30 }
 0x2c9   :  { %v1593_v21 = vpop.f32.mrf.mxu0 }
 0x2ca   :  { %v1594_v25 = vadd.f32 %v1593_v21, %v1310_v17 }
 0x2e4   :  { %v1630_v19 = vpop.f32.mrf.mxu1 }
 0x2e5   :  { %v1631_v39 = vadd.f32 %v1630_v19, %v1588_v32 }
 0x2e6   :  { %v1632_v22 = vpop.f32.mrf.mxu1 }
 0x2e7   :  { %v1633_v23 = vadd.f32 %v1632_v22, %v1590_v20 }
 0x2e8   :  { %v1634_v24 = vpop.f32.mrf.mxu1 }
 0x2e9   :  { %v1639_v26 = vmul.f32 1.442695, %v1633_v23  ;;  %v1635_v43 = vadd.f32 %v1634_v24, %v1592_v36 }
 0x2ea   :  { %v1636_v27 = vpop.f32.mrf.mxu1 }
 0x2eb   :  { %2157 = vpow2.f32 %v1639_v26  ;;  %v1637_v28 = vadd.f32 %v1636_v27, %v1594_v25 }
 0x2ed   :  { %v1641_v29 = vmul.f32 1.442695, %v1637_v28 }
 0x2ef   :  { %2159 = vpow2.f32 %v1641_v29 }
 0x2f8   :  { %v2158_v33 = vpop.eup %2157 }
 0x2f9   :  { %v1645_v34 = vmul.f32 %v2158_v33, %v1643_v31 }
 0x2fb   :  { %v1647_v37 = vadd.f32 %v1645_v34, %v1631_v39 }
 0x2fc   :  { %v2160_v40 = vpop.eup %2159 }
 0x2fd   :  { %v1646_v44 = vmul.f32 %v2160_v40, %v1644_v35  ;;  %2161 = vtanh.f32 %v1647_v37 }
 0x2ff   :  { %v1648_v45 = vadd.f32 %v1646_v44, %v1635_v43 }
 0x301   :  { %2163 = vtanh.f32 %v1648_v45 }
 0x30a   :  { %v2162_v46 = vpop.eup %2161 }
 0x30b   :  { %1651 = vst [vmem:[#allocation11] sm:$0xff] %v2162_v46 }
 0x30e   :  { %v2164_v41 = vpop.eup %2163 }
 0x30f   :  { %1652 = vst [vmem:[#allocation11 + $0x8] sm:$0xff] %v2164_v41 }
 0x310   :  { %2276 = shalt.err (!%p2273_p1)
}
 0x311   :  { %1664 = dma.vmem_to_hbm [thread:$0]  %s1659_s17, 256, %s2428_s8, [#allocation4], %s2294_s30, %s2294_s30, %s2295_s9  }
 0x312   :  { %2291 = dma.done.wait [#allocation4], 256  }
 0x313   :  { %2292 = vsyncadd [#allocation4], 4294967040 }
 0x314   :  { %1668 = vsyncpa [#allocation3], 1 }
 0x315   :  { %1669 = vsyncpa [#allocation6], 1 }
 0x316   :  { %1670 = vsyncpa [#allocation9], 1 }
 0x317   :  { %1671 = vsyncpa [#allocation4], 1 }

</bundles_post_ra>
